<compile_context>
chip_gen: v7x
topology: tpu7x:2x2x1
jax: 0.10.0
libtpu: 0.0.40
codegen_flags: <defaults>
</compile_context>

<pallas_src>
import jax
import jax.numpy as jnp
from jax import lax
from jax.experimental import pallas as pl
from jax.experimental.pallas import tpu as pltpu

LN_EPS = 1e-5


def _round_up(n, m):
    return ((n + m - 1) // m) * m


def _cdiv(a, b):
    return (a + b - 1) // b


def _ln_relu(h, gamma, beta, n_feat):
    """LayerNorm over the feature/sublane axis of an (n_feat, TB) tile, then ReLU.

    Feature-axis reductions go through the (idle) MXU via ones-row matmuls and the
    variance uses the one-pass E[h^2] - mu^2 form, keeping the binding VPU slot free.
    All math stays in f32.
    """
    r = jnp.full((1, n_feat), 1.0 / n_feat, dtype=jnp.float32)
    mu = jnp.dot(r, h, preferred_element_type=jnp.float32)          # (1, TB)
    msq = jnp.dot(r, h * h, preferred_element_type=jnp.float32)     # (1, TB)
    var = jnp.maximum(msq - mu * mu, 0.0)
    inv = lax.rsqrt(var + LN_EPS)                                   # (1, TB), EUP
    out = (h - mu) * inv * gamma + beta
    return jnp.maximum(out, 0.0)


def _make_policy_kernel(h1, h2, act_dim):
    def kernel(x_ref, w1_ref, w2_ref, wm_ref, vecs_ref, meanT_ref):
        # vecs packs every small per-feature vector into one resident DMA:
        #   col 0: b1, 1: gamma1, 2: beta1, 3: b2, 4: gamma2, 5: beta2, 6: bm
        b1 = vecs_ref[0:h1, 0:1]
        g1 = vecs_ref[0:h1, 1:2]
        be1 = vecs_ref[0:h1, 2:3]
        b2 = vecs_ref[0:h2, 3:4]
        g2 = vecs_ref[0:h2, 4:5]
        be2 = vecs_ref[0:h2, 5:6]
        bm = vecs_ref[0:act_dim, 6:7]

        x = x_ref[...]  # (TB, obs_dim): natural batch-major block, no wrapper transpose

        # fc1: minor-minor contraction -> feature-major (h1, TB), batch on the lane axis.
        z = lax.dot_general(w1_ref[...], x, (((1,), (1,)), ((), ())),
                            preferred_element_type=jnp.float32) + b1
        h = _ln_relu(z, g1, be1, h1)

        # fc2: Linear -> LayerNorm -> ReLU (feature-major throughout).
        z = jnp.dot(w2_ref[...], h, preferred_element_type=jnp.float32) + b2
        h = _ln_relu(z, g2, be2, h2)

        # Action-mean head; (act_dim, TB) store is lane-dense over the batch.
        m = jnp.dot(wm_ref[...], h, preferred_element_type=jnp.float32) + bm
        meanT_ref[...] = m.astype(meanT_ref.dtype)

        # TODO(synk): dropout_rate > 0 (train-mode stochastic dropout) not implemented;
        # the reference config uses dropout_rate = 0.0.

    return kernel


def _choose_batch_tile(B, max_tb, target_steps=8):
    """Lane-aligned (multiple-of-128) batch tile; aim for >= target_steps grid steps
    so v7x's two TensorCores both get work via the 'parallel' axis and per-step
    overhead is amortized, capped at max_tb (per-step VMEM stays tiny everywhere)."""
    b_lanes = _round_up(max(B, 1), 128)
    tb = _round_up(_cdiv(b_lanes, target_steps), 128)
    return max(128, min(max_tb, tb))


def policy_forward(x, params, *, max_tb=4096):
    """Fused Pallas forward pass. Returns (mean, std) — the parameters of the Normal
    distribution the PyTorch module wraps in torch.distributions.Normal."""
    squeeze = x.ndim == 1
    if squeeze:
        x = x[None, :]
    B, obs_dim = x.shape
    h1 = params["w1"].shape[0]
    h2 = params["w2"].shape[0]
    act_dim = params["wm"].shape[0]
    pmax = max(h1, h2, act_dim)

    TB = _choose_batch_tile(B, max_tb)
    grid = (_cdiv(B, TB),)

    # Pack all small per-feature vectors into one (pmax, 8) array -> one DMA.
    vecs = jnp.zeros((pmax, 8), jnp.float32)
    vecs = vecs.at[:h1, 0].set(params["b1"])
    vecs = vecs.at[:h1, 1].set(params["g1"])
    vecs = vecs.at[:h1, 2].set(params["be1"])
    vecs = vecs.at[:h2, 3].set(params["b2"])
    vecs = vecs.at[:h2, 4].set(params["g2"])
    vecs = vecs.at[:h2, 5].set(params["be2"])
    vecs = vecs.at[:act_dim, 6].set(params["bm"])

    kernel = _make_policy_kernel(h1, h2, act_dim)

    meanT = pl.pallas_call(
        kernel,
        out_shape=jax.ShapeDtypeStruct((act_dim, B), jnp.float32),
        grid=grid,
        in_specs=[
            pl.BlockSpec((TB, obs_dim), lambda i: (i, 0)),   # x: streamed, double-buffered
            pl.BlockSpec((h1, obs_dim), lambda i: (0, 0)),   # weights: VMEM-resident
            pl.BlockSpec((h2, h1), lambda i: (0, 0)),
            pl.BlockSpec((act_dim, h2), lambda i: (0, 0)),
            pl.BlockSpec((pmax, 8), lambda i: (0, 0)),       # packed bias/LN params
        ],
        out_specs=pl.BlockSpec((act_dim, TB), lambda i: (0, i)),
        compiler_params=pltpu.CompilerParams(
            dimension_semantics=("parallel",),   # batch tiles split across v7x's 2 TCs
        ),
    )(x, params["w1"], params["w2"], params["wm"], vecs)

    # Tiny (act_dim, B) -> (B, act_dim); the kernel keeps the lane-dense orientation.
    mean = meanT.T
    # std = exp(log_std) is data-independent: computed once here, broadcast lazily.
    std = jnp.broadcast_to(jnp.exp(params["log_std"]), mean.shape)
    if squeeze:
        mean, std = mean[0], std[0]
    return mean, std


def init_params(key, obs_dim, hidden_dims, act_dim):
    """Deterministic init mimicking nn.Linear's U(-1/sqrt(fan_in), 1/sqrt(fan_in)).
    Weights are stored in PyTorch layout [out_features, in_features]."""
    params = {}
    dims = [obs_dim] + list(hidden_dims)
    keys = jax.random.split(key, 2 * len(hidden_dims) + 2)
    k = 0
    for i, (din, dout) in enumerate(zip(dims[:-1], dims[1:]), start=1):
        bound = 1.0 / (din ** 0.5)
        params[f"w{i}"] = jax.random.uniform(keys[k], (dout, din), jnp.float32, -bound, bound); k += 1
        params[f"b{i}"] = jax.random.uniform(keys[k], (dout,), jnp.float32, -bound, bound); k += 1
        # LayerNorm affine params (PyTorch default: gamma=1, beta=0)
        params[f"g{i}"] = jnp.ones((dout,), jnp.float32)
        params[f"be{i}"] = jnp.zeros((dout,), jnp.float32)
    din = dims[-1]
    bound = 1.0 / (din ** 0.5)
    params["wm"] = jax.random.uniform(keys[k], (act_dim, din), jnp.float32, -bound, bound); k += 1
    params["bm"] = jax.random.uniform(keys[k], (act_dim,), jnp.float32, -bound, bound); k += 1
    # nn.Parameter(torch.zeros(1, action_dim))
    params["log_std"] = jnp.zeros((1, act_dim), jnp.float32)
    return params


def reference_forward(x, p):
    """Pure-JAX batch-major reference matching the PyTorch module (true-f32 matmuls)."""
    hp = lax.Precision.HIGHEST

    def ln(h, g, b):
        mu = jnp.mean(h, axis=-1, keepdims=True)
        var = jnp.mean((h - mu) ** 2, axis=-1, keepdims=True)
        return (h - mu) * lax.rsqrt(var + LN_EPS) * g + b

    h = jnp.matmul(x, p["w1"].T, precision=hp) + p["b1"]
    h = jnp.maximum(ln(h, p["g1"], p["be1"]), 0.0)
    h = jnp.matmul(h, p["w2"].T, precision=hp) + p["b2"]
    h = jnp.maximum(ln(h, p["g2"], p["be2"]), 0.0)
    mean = jnp.matmul(h, p["wm"].T, precision=hp) + p["bm"]
    std = jnp.exp(jnp.broadcast_to(p["log_std"], mean.shape))
    return mean, std


if __name__ == "__main__":
    OBS_DIM, HIDDEN, ACT_DIM = 8, [32, 32], 2

    key = jax.random.PRNGKey(0)
    kp, kx1, kx2 = jax.random.split(key, 3)
    params = init_params(kp, OBS_DIM, HIDDEN, ACT_DIM)

    fwd = jax.jit(policy_forward)

    # Case 1: tiny batch (single, partially-filled block).
    x1 = jax.random.normal(kx1, (2, OBS_DIM), jnp.float32)
    mean1, std1 = fwd(x1, params)
    jax.block_until_ready((mean1, std1))
    ref_mean1, ref_std1 = reference_forward(x1, params)
    assert mean1.shape == (2, ACT_DIM) and std1.shape == (2, ACT_DIM)
    assert jnp.allclose(mean1, ref_mean1, atol=2e-3, rtol=2e-3), "mean mismatch (B=2)"
    assert jnp.allclose(std1, ref_std1, atol=1e-6, rtol=1e-6), "std mismatch (B=2)"

    # Case 2: several grid steps plus a partial trailing block (exercises the
    # 'parallel' batch axis and boundary masking).
    x2 = jax.random.normal(kx2, (300, OBS_DIM), jnp.float32)
    mean2, std2 = fwd(x2, params)
    jax.block_until_ready((mean2, std2))
    ref_mean2, ref_std2 = reference_forward(x2, params)
    assert mean2.shape == (300, ACT_DIM)
    assert jnp.allclose(mean2, ref_mean2, atol=2e-3, rtol=2e-3), "mean mismatch (B=300)"
    assert jnp.allclose(std2, ref_std2, atol=1e-6, rtol=1e-6), "std mismatch (B=300)"

    print("KERNEL_OK")
</pallas_src>

<mosaic_0001>
module attributes {stable_mosaic.version = 11 : i64} {
  func.func @kernel(%arg0: i32, %arg1: memref<128x8xf32, #tpu.memory_space<vmem>>, %arg2: memref<32x8xf32, #tpu.memory_space<vmem>>, %arg3: memref<32x32xf32, #tpu.memory_space<vmem>>, %arg4: memref<2x32xf32, #tpu.memory_space<vmem>>, %arg5: memref<32x8xf32, #tpu.memory_space<vmem>>, %arg6: memref<2x128xf32, #tpu.memory_space<vmem>>) attributes {dimension_semantics = [#tpu.dimension_semantics<parallel>], iteration_bounds = array<i64: 1>, scalar_prefetch = 0 : i64, scratch_operands = 0 : i64, tpu.core_type = #tpu.core_type<tc>, window_params = [{transform_indices = @transform_0, window_bounds = array<i64: 128, 8>}, {pipeline_mode = #tpu.pipeline_mode<synchronous>, transform_indices = @transform_1, window_bounds = array<i64: 32, 8>}, {pipeline_mode = #tpu.pipeline_mode<synchronous>, transform_indices = @transform_2, window_bounds = array<i64: 32, 32>}, {pipeline_mode = #tpu.pipeline_mode<synchronous>, transform_indices = @transform_3, window_bounds = array<i64: 2, 32>}, {pipeline_mode = #tpu.pipeline_mode<synchronous>, transform_indices = @transform_4, window_bounds = array<i64: 32, 8>}, {transform_indices = @transform_5, window_bounds = array<i64: 2, 128>}]} {
    %c0 = arith.constant 0 : index
    %c0_0 = arith.constant 0 : index
    %0 = vector.load %arg5[%c0, %c0_0] : memref<32x8xf32, #tpu.memory_space<vmem>>, vector<32x1xf32>
    %c0_1 = arith.constant 0 : index
    %c1 = arith.constant 1 : index
    %1 = vector.load %arg5[%c0_1, %c1] : memref<32x8xf32, #tpu.memory_space<vmem>>, vector<32x1xf32>
    %c0_2 = arith.constant 0 : index
    %c2 = arith.constant 2 : index
    %2 = vector.load %arg5[%c0_2, %c2] : memref<32x8xf32, #tpu.memory_space<vmem>>, vector<32x1xf32>
    %c0_3 = arith.constant 0 : index
    %c3 = arith.constant 3 : index
    %3 = vector.load %arg5[%c0_3, %c3] : memref<32x8xf32, #tpu.memory_space<vmem>>, vector<32x1xf32>
    %c0_4 = arith.constant 0 : index
    %c4 = arith.constant 4 : index
    %4 = vector.load %arg5[%c0_4, %c4] : memref<32x8xf32, #tpu.memory_space<vmem>>, vector<32x1xf32>
    %c0_5 = arith.constant 0 : index
    %c5 = arith.constant 5 : index
    %5 = vector.load %arg5[%c0_5, %c5] : memref<32x8xf32, #tpu.memory_space<vmem>>, vector<32x1xf32>
    %c0_6 = arith.constant 0 : index
    %c6 = arith.constant 6 : index
    %6 = vector.load %arg5[%c0_6, %c6] : memref<32x8xf32, #tpu.memory_space<vmem>>, vector<2x1xf32>
    %c0_7 = arith.constant 0 : index
    %c0_8 = arith.constant 0 : index
    %7 = vector.load %arg1[%c0_7, %c0_8] : memref<128x8xf32, #tpu.memory_space<vmem>>, vector<128x8xf32>
    %c0_9 = arith.constant 0 : index
    %c0_10 = arith.constant 0 : index
    %8 = vector.load %arg2[%c0_9, %c0_10] : memref<32x8xf32, #tpu.memory_space<vmem>>, vector<32x8xf32>
    %cst = arith.constant dense<0.000000e+00> : vector<32x128xf32>
    %9 = tpu.matmul %8, %7, %cst {dimension_numbers = #tpu.dot_dimension_numbers<[1], [1], [0], [0], [0, 0, 1, 0], [], []>} : vector<32x8xf32>, vector<128x8xf32>, vector<32x128xf32> -> vector<32x128xf32>
    %10 = vector.broadcast %0 : vector<32x1xf32> to vector<32x128xf32>
    %11 = arith.addf %9, %10 : vector<32x128xf32>
    %cst_11 = arith.constant 3.125000e-02 : f32
    %12 = vector.broadcast %cst_11 : f32 to vector<1x32xf32>
    %cst_12 = arith.constant dense<0.000000e+00> : vector<1x128xf32>
    %13 = tpu.matmul %12, %11, %cst_12 {dimension_numbers = #tpu.dot_dimension_numbers<[1], [0], [0], [1], [0, 0, 1, 1], [], []>} : vector<1x32xf32>, vector<32x128xf32>, vector<1x128xf32> -> vector<1x128xf32>
    %14 = arith.mulf %11, %11 : vector<32x128xf32>
    %cst_13 = arith.constant dense<0.000000e+00> : vector<1x128xf32>
    %15 = tpu.matmul %12, %14, %cst_13 {dimension_numbers = #tpu.dot_dimension_numbers<[1], [0], [0], [1], [0, 0, 1, 1], [], []>} : vector<1x32xf32>, vector<32x128xf32>, vector<1x128xf32> -> vector<1x128xf32>
    %16 = arith.mulf %13, %13 : vector<1x128xf32>
    %17 = arith.subf %15, %16 : vector<1x128xf32>
    %cst_14 = arith.constant 0.000000e+00 : f32
    %18 = vector.broadcast %cst_14 : f32 to vector<1x128xf32>
    %19 = arith.maximumf %17, %18 : vector<1x128xf32>
    %cst_15 = arith.constant 9.99999974E-6 : f32
    %20 = vector.broadcast %cst_15 : f32 to vector<1x128xf32>
    %21 = arith.addf %19, %20 : vector<1x128xf32>
    %22 = math.rsqrt %21 : vector<1x128xf32>
    %23 = vector.broadcast %13 : vector<1x128xf32> to vector<32x128xf32>
    %24 = arith.subf %11, %23 : vector<32x128xf32>
    %25 = vector.broadcast %22 : vector<1x128xf32> to vector<32x128xf32>
    %26 = arith.mulf %24, %25 : vector<32x128xf32>
    %27 = vector.broadcast %1 : vector<32x1xf32> to vector<32x128xf32>
    %28 = arith.mulf %26, %27 : vector<32x128xf32>
    %29 = vector.broadcast %2 : vector<32x1xf32> to vector<32x128xf32>
    %30 = arith.addf %28, %29 : vector<32x128xf32>
    %cst_16 = arith.constant 0.000000e+00 : f32
    %31 = vector.broadcast %cst_16 : f32 to vector<32x128xf32>
    %32 = arith.maximumf %30, %31 : vector<32x128xf32>
    %c0_17 = arith.constant 0 : index
    %c0_18 = arith.constant 0 : index
    %33 = vector.load %arg3[%c0_17, %c0_18] : memref<32x32xf32, #tpu.memory_space<vmem>>, vector<32x32xf32>
    %cst_19 = arith.constant dense<0.000000e+00> : vector<32x128xf32>
    %34 = tpu.matmul %33, %32, %cst_19 {dimension_numbers = #tpu.dot_dimension_numbers<[1], [0], [0], [1], [0, 0, 1, 1], [], []>} : vector<32x32xf32>, vector<32x128xf32>, vector<32x128xf32> -> vector<32x128xf32>
    %35 = vector.broadcast %3 : vector<32x1xf32> to vector<32x128xf32>
    %36 = arith.addf %34, %35 : vector<32x128xf32>
    %cst_20 = arith.constant 3.125000e-02 : f32
    %37 = vector.broadcast %cst_20 : f32 to vector<1x32xf32>
    %cst_21 = arith.constant dense<0.000000e+00> : vector<1x128xf32>
    %38 = tpu.matmul %37, %36, %cst_21 {dimension_numbers = #tpu.dot_dimension_numbers<[1], [0], [0], [1], [0, 0, 1, 1], [], []>} : vector<1x32xf32>, vector<32x128xf32>, vector<1x128xf32> -> vector<1x128xf32>
    %39 = arith.mulf %36, %36 : vector<32x128xf32>
    %cst_22 = arith.constant dense<0.000000e+00> : vector<1x128xf32>
    %40 = tpu.matmul %37, %39, %cst_22 {dimension_numbers = #tpu.dot_dimension_numbers<[1], [0], [0], [1], [0, 0, 1, 1], [], []>} : vector<1x32xf32>, vector<32x128xf32>, vector<1x128xf32> -> vector<1x128xf32>
    %41 = arith.mulf %38, %38 : vector<1x128xf32>
    %42 = arith.subf %40, %41 : vector<1x128xf32>
    %cst_23 = arith.constant 0.000000e+00 : f32
    %43 = vector.broadcast %cst_23 : f32 to vector<1x128xf32>
    %44 = arith.maximumf %42, %43 : vector<1x128xf32>
    %cst_24 = arith.constant 9.99999974E-6 : f32
    %45 = vector.broadcast %cst_24 : f32 to vector<1x128xf32>
    %46 = arith.addf %44, %45 : vector<1x128xf32>
    %47 = math.rsqrt %46 : vector<1x128xf32>
    %48 = vector.broadcast %38 : vector<1x128xf32> to vector<32x128xf32>
    %49 = arith.subf %36, %48 : vector<32x128xf32>
    %50 = vector.broadcast %47 : vector<1x128xf32> to vector<32x128xf32>
    %51 = arith.mulf %49, %50 : vector<32x128xf32>
    %52 = vector.broadcast %4 : vector<32x1xf32> to vector<32x128xf32>
    %53 = arith.mulf %51, %52 : vector<32x128xf32>
    %54 = vector.broadcast %5 : vector<32x1xf32> to vector<32x128xf32>
    %55 = arith.addf %53, %54 : vector<32x128xf32>
    %cst_25 = arith.constant 0.000000e+00 : f32
    %56 = vector.broadcast %cst_25 : f32 to vector<32x128xf32>
    %57 = arith.maximumf %55, %56 : vector<32x128xf32>
    %c0_26 = arith.constant 0 : index
    %c0_27 = arith.constant 0 : index
    %58 = vector.load %arg4[%c0_26, %c0_27] : memref<2x32xf32, #tpu.memory_space<vmem>>, vector<2x32xf32>
    %cst_28 = arith.constant dense<0.000000e+00> : vector<2x128xf32>
    %59 = tpu.matmul %58, %57, %cst_28 {dimension_numbers = #tpu.dot_dimension_numbers<[1], [0], [0], [1], [0, 0, 1, 1], [], []>} : vector<2x32xf32>, vector<32x128xf32>, vector<2x128xf32> -> vector<2x128xf32>
    %60 = vector.broadcast %6 : vector<2x1xf32> to vector<2x128xf32>
    %61 = arith.addf %59, %60 : vector<2x128xf32>
    %c0_29 = arith.constant 0 : index
    %c0_30 = arith.constant 0 : index
    %62 = vector.load %arg6[%c0_29, %c0_30] : memref<2x128xf32, #tpu.memory_space<vmem>>, vector<2x128xf32>
    tpu.vector_store %arg6[%c0_29, %c0_30], %61 {strides = array<i32>} : memref<2x128xf32, #tpu.memory_space<vmem>>, vector<2x128xf32>,
    return
  }
  func.func @transform_0(%arg0: i32) -> (i32, i32) {
    %c0_i32 = arith.constant 0 : i32
    %c0_i32_0 = arith.constant 0 : i32
    return %arg0, %c0_i32 : i32, i32
  }
  func.func @transform_1(%arg0: i32) -> (i32, i32) {
    %c0_i32 = arith.constant 0 : i32
    %c0_i32_0 = arith.constant 0 : i32
    %c0_i32_1 = arith.constant 0 : i32
    return %c0_i32, %c0_i32_0 : i32, i32
  }
  func.func @transform_2(%arg0: i32) -> (i32, i32) {
    %c0_i32 = arith.constant 0 : i32
    %c0_i32_0 = arith.constant 0 : i32
    %c0_i32_1 = arith.constant 0 : i32
    return %c0_i32, %c0_i32_0 : i32, i32
  }
  func.func @transform_3(%arg0: i32) -> (i32, i32) {
    %c0_i32 = arith.constant 0 : i32
    %c0_i32_0 = arith.constant 0 : i32
    %c0_i32_1 = arith.constant 0 : i32
    return %c0_i32, %c0_i32_0 : i32, i32
  }
  func.func @transform_4(%arg0: i32) -> (i32, i32) {
    %c0_i32 = arith.constant 0 : i32
    %c0_i32_0 = arith.constant 0 : i32
    %c0_i32_1 = arith.constant 0 : i32
    return %c0_i32, %c0_i32_0 : i32, i32
  }
  func.func @transform_5(%arg0: i32) -> (i32, i32) {
    %c0_i32 = arith.constant 0 : i32
    %c0_i32_0 = arith.constant 0 : i32
    return %c0_i32, %arg0 : i32, i32
  }
}

</mosaic_0001>

<bundles_post_ra>
// kernel: policy_forward.1
= control target key start
LH: loop header
LB: loop body
LE: loop exit
PB: predicated region body
PF: predicated region fallthrough
CT: control target
= control target key end

     0   :  { %vm65_vm0 = vcmask 64512   ;;  %v1142_v3 = vmov 0   ;;  %v1143_v34 = vmov 0.0|0.0   ;;  %vm1144_vm2 = vmmov 0   ;;  %s1401_s0 = inlined_call_operand.vmem [shape: f32[2,8], index: 0, kind: input, shape index: {}]   ;;  %s1402_s1 = inlined_call_operand.vmem [shape: f32[32,8], index: 1, kind: input, shape index: {}]   ;;  %s1403_s4 = inlined_call_operand.vmem [shape: f32[32,8], index: 4, kind: input, shape index: {}]   ;;  %s1404_s2 = inlined_call_operand.vmem [shape: f32[32,32], index: 2, kind: input, shape index: {}]   ;;  %s1405_s3 = inlined_call_operand.vmem [shape: f32[2,32], index: 3, kind: input, shape index: {}]   ;;  %s1406_s5 = inlined_call_operand.vmem [shape: f32[2,2], index: 5, kind: output, shape index: {}]  }
   0x1   :  { %v25_v0 = vld [vmem:[%s1401_s0] sm:$0xff]  ;;  %v26_v1 = vld [vmem:[%s1401_s0 + $0x8] sm:$0xff]  ;;  %vm1191_vm1 = vmpackc.low %vm65_vm0, %vm65_vm0  ;;  %1120 = vset.pattern.permute.xlu0 %v1142_v3  ;;  %1121 = vset.pattern.permute.xlu1 %v1142_v3  ;;  %v1145_v35 = vmov 0.0   ;;  %v1146_v36 = vmov 1   ;;  %v1147_v37 = vmov 2   ;;  %vm211_vm3 = vcmask 261120  }
   0x2   :  { %v1023_v4 = vpack.c.bf16 %v26_v1, %v25_v0  ;;  %v27_v5 = vld [vmem:[%s1401_s0 + $0x10] sm:$0xff]  ;;  %v28_v6 = vld [vmem:[%s1401_s0 + $0x18] sm:$0xff]  ;;  %v41_v8 = vld [vmem:[%s1402_s1] sm:$0xff]  ;;  %1071 = vmatprep.subr.bf16.mxu1 %v1143_v34  ;;  %962 = vmatprep.mubr.msk.f32.mxu1 %vm1144_vm2, %v1145_v35  ;;  %v1148_v57 = vmov 0.03125   ;;  %v1149_v60 = vmov 3   ;;  %v364_v2 = vlaneseq }
   0x3   :  { %v1029_v7 = vpack.c.bf16 %v28_v6, %v27_v5  ;;  %v29_v9 = vld [vmem:[%s1401_s0 + $0x20] sm:$0xff]  ;;  %v30_v10 = vld [vmem:[%s1401_s0 + $0x28] sm:$0xff]  ;;  %948 = vmatprep.mubr.msk.f32.mxu0 %vm65_vm0, %v41_v8  ;;  %v1225_v12 = vld [vmem:[%s1403_s4 + $0x10] sm:$0xff] }
   0x4   :  { %1025 = vmatprep.subr.msk.bf16.mxu0 %vm1191_vm1, %v1023_v4  ;;  %v1220_v11 = vld [vmem:[%s1403_s4] sm:$0xff]  ;;  %57 = vperm.xlu1 %1121, %v1225_v12   ;;  %v1035_v13 = vpack.c.bf16 %v30_v10, %v29_v9  ;;  %v1232_v14 = vld [vmem:[%s1403_s4 + $0x8] sm:$0xff]  ;;  %v1237_v15 = vld [vmem:[%s1403_s4 + $0x18] sm:$0xff] }
   0x5   :  { %1028 = vmatpush3.bf16.xpose.msk.msra.mxu0 %vm1191_vm1, %v1023_v4  ;;  %47 = vperm.xlu0 %1120, %v1220_v11   ;;  %v31_v16 = vld [vmem:[%s1401_s0 + $0x30] sm:$0xff]  ;;  %v32_v17 = vld [vmem:[%s1401_s0 + $0x38] sm:$0xff]  ;;  %v33_v19 = vld [vmem:[%s1401_s0 + $0x40] sm:$0xff] }
   0x6   :  { %1031 = vmatprep.subr.msk.bf16.mxu0 %vm1191_vm1, %v1029_v7  ;;  %v1041_v18 = vpack.c.bf16 %v32_v17, %v31_v16  ;;  %v34_v20 = vld [vmem:[%s1401_s0 + $0x48] sm:$0xff]  ;;  %v35_v22 = vld [vmem:[%s1401_s0 + $0x50] sm:$0xff]  ;;  %v36_v23 = vld [vmem:[%s1401_s0 + $0x58] sm:$0xff] }
   0x7   :  { %v1047_v21 = vpack.c.bf16 %v34_v20, %v33_v19  ;;  %v1053_v24 = vpack.c.bf16 %v36_v23, %v35_v22  ;;  %v37_v25 = vld [vmem:[%s1401_s0 + $0x60] sm:$0xff]  ;;  %v38_v26 = vld [vmem:[%s1401_s0 + $0x68] sm:$0xff]  ;;  %v39_v28 = vld [vmem:[%s1401_s0 + $0x70] sm:$0xff] }
   0x8   :  { %62 = vperm.xlu1 %1121, %v1237_v15   ;;  %v1059_v27 = vpack.c.bf16 %v38_v26, %v37_v25  ;;  %v40_v29 = vld [vmem:[%s1401_s0 + $0x78] sm:$0xff]  ;;  %v42_v31 = vld [vmem:[%s1402_s1 + $0x8] sm:$0xff]  ;;  %v43_v32 = vld [vmem:[%s1402_s1 + $0x10] sm:$0xff] }
   0x9   :  { %52 = vperm.xlu0 %1120, %v1232_v14   ;;  %v1065_v30 = vpack.c.bf16 %v40_v29, %v39_v28  ;;  %v44_v33 = vld [vmem:[%s1402_s1 + $0x18] sm:$0xff]  ;;  %v424_v59 = vld [vmem:[%s1404_s2] sm:$0xff] }
   0xc   :  { %1123 = vset.pattern.permute.xlu1 %v1146_v36 }
   0xd   :  { %1034 = vmatpush3.bf16.xpose.msk.msra.mxu0 %vm1191_vm1, %v1029_v7  ;;  %1122 = vset.pattern.permute.xlu0 %v1146_v36  ;;  %v365_v7 = vshrl.u32 %v364_v2, 7 }
   0xe   :  { %1037 = vmatprep.subr.msk.bf16.mxu0 %vm1191_vm1, %v1035_v13  ;;  %385 = vperm.xlu1 %1123, %v1232_v14  }
   0xf   :  { %381 = vperm.xlu0 %1122, %v1220_v11   ;;  %v1347_v9 = vsub.s32 0, %v365_v7 }
  0x12   :  { %1124 = vset.pattern.permute.xlu1 %v1147_v37 }
  0x13   :  { %1125 = vset.pattern.permute.xlu0 %v1147_v37  ;;  %401 = vperm.xlu1 %1124, %v1220_v11  }
  0x14   :  { %405 = vperm.xlu0 %1125, %v1232_v14  }
  0x15   :  { %1040 = vmatpush3.bf16.xpose.msk.msra.mxu0 %vm1191_vm1, %v1035_v13 }
  0x16   :  { %1043 = vmatprep.subr.msk.bf16.mxu0 %vm1191_vm1, %v1041_v18 }
  0x17   :  { %1126 = vset.pattern.permute.xlu1 %v1146_v36 }
  0x18   :  { %409 = vperm.xlu0 %1125, %v1225_v12   ;;  %389 = vperm.xlu1 %1126, %v1225_v12  }
  0x1c   :  { %393 = vperm.xlu1 %1126, %v1237_v15   ;;  %1128 = vset.pattern.permute.xlu0 %v1149_v60 }
  0x1d   :  { %1046 = vmatpush3.bf16.xpose.msk.msra.mxu0 %vm1191_vm1, %v1041_v18  ;;  %429 = vperm.xlu0 %1128, %v1220_v11  }
  0x1e   :  { %1049 = vmatprep.subr.msk.bf16.mxu0 %vm1191_vm1, %v1047_v21 }
  0x20   :  { %1127 = vset.pattern.permute.xlu1 %v1147_v37 }
  0x21   :  { %413 = vperm.xlu1 %1127, %v1237_v15   ;;  %441 = vperm.xlu0 %1128, %v1237_v15  }
  0x25   :  { %1052 = vmatpush3.bf16.xpose.msk.msra.mxu0 %vm1191_vm1, %v1047_v21  ;;  %1129 = vset.pattern.permute.xlu1 %v1149_v60 }
  0x26   :  { %1055 = vmatprep.subr.msk.bf16.mxu0 %vm1191_vm1, %v1053_v24  ;;  %433 = vperm.xlu1 %1129, %v1232_v14  }
  0x2a   :  { %437 = vperm.xlu1 %1129, %v1225_v12  }
  0x2d   :  { %1058 = vmatpush3.bf16.xpose.msk.msra.mxu0 %vm1191_vm1, %v1053_v24 }
  0x2e   :  { %1061 = vmatprep.subr.msk.bf16.mxu0 %vm1191_vm1, %v1059_v27 }
  0x35   :  { %1064 = vmatpush3.bf16.xpose.msk.msra.mxu0 %vm1191_vm1, %v1059_v27 }
  0x36   :  { %1067 = vmatprep.subr.msk.bf16.mxu0 %vm1191_vm1, %v1065_v30 }
  0x3d   :  { %1070 = vmatpush3.bf16.xpose.msk.msra.mxu0 %vm1191_vm1, %v1065_v30 }
  0x44   :  { %949 = vmatmul.mubr.msk.f32.vlgmr.msra.gmra.mrb[0].mxu0 %vm65_vm0, %v42_v31 }
  0x45   :  { %951 = vmatprep.mubr.msk.f32.mxu0 %vm65_vm0, %v43_v32 }
  0x48   :  { %952 = vmatmul.mubr.msk.f32.gmra.mrb[2].mxu0 %vm65_vm0, %v44_v33 }
  0x83   :  { %v58_v39 = vpop.permute.xlu1 %57 }
  0x84   :  { %v48_v38 = vpop.permute.xlu0 %47 }
  0x87   :  { %v63_v45 = vpop.permute.xlu1 %62 }
  0x88   :  { %v53_v40 = vpop.permute.xlu0 %52 }
  0x8d   :  { %v386_v63 = vpop.permute.xlu1 %385 }
  0x8e   :  { %v382_v13 = vpop.permute.xlu0 %381 }
  0x92   :  { %v402_v6 = vpop.permute.xlu1 %401 }
  0x93   :  { %v406_v18 = vpop.permute.xlu0 %405 }
  0x97   :  { %v390_v10 = vpop.permute.xlu1 %389  ;;  %v410_v30 = vpop.permute.xlu0 %409 }
  0x9b   :  { %v394_v17 = vpop.permute.xlu1 %393 }
  0xa0   :  { %v414_v29 = vpop.permute.xlu1 %413 }
 0x117   :  { %v950_v41 = vpop.f32.mrb[0].mxu0 }
 0x118   :  { %v1320_v42 = vadd.f32 %v950_v41, %v53_v40  ;;  %v192_v43 = vpop.f32.mrb[1].mxu0 }
 0x119   :  { %v1322_v44 = vadd.f32 %v192_v43, %v48_v38 }
 0x11a   :  { %v286_v51 = vmul.f32 %v1320_v42, %v1320_v42 }
 0x11b   :  { %v953_v46 = vpop.f32.mrb[2].mxu0  ;;  %v1072_v47 = vpack.c.bf16 %v1320_v42, %v1322_v44  ;;  %v285_v52 = vmul.f32 %v1322_v44, %v1322_v44 }
 0x11c   :  { %v208_v48 = vadd.f32 %v953_v46, %v63_v45  ;;  %v202_v49 = vpop.f32.mrb[3].mxu0 }
 0x11d   :  { %v203_v50 = vadd.f32 %v202_v49, %v58_v39  ;;  %1073 = vmatpush3.bf16.msra.mxu1 %v1072_v47  ;;  %v1078_v54 = vpack.c.bf16 %v286_v51, %v285_v52  ;;  %v425_v47 = vld [vmem:[%s1404_s2 + $0x8] sm:$0xff]  ;;  %v427_v49 = vld [vmem:[%s1404_s2 + $0x18] sm:$0xff]  ;;  %v1151_v51 = vmov 5   ;;  %v430_v52 = vpop.permute.xlu0 %429 }
 0x11e   :  { %1074 = vmatprep.subr.bf16.mxu1 %v1143_v34  ;;  %v288_v55 = vmul.f32 %v208_v48, %v208_v48 }
 0x11f   :  { %v1075_v53 = vpack.c.bf16 %v208_v48, %v203_v50  ;;  %v287_v56 = vmul.f32 %v203_v50, %v203_v50 }
 0x121   :  { %1076 = vmatpush3.bf16.msra.mxu1 %v1075_v53  ;;  %v1081_v58 = vpack.c.bf16 %v288_v55, %v287_v56  ;;  %v434_v53 = vpop.permute.xlu1 %433 }
 0x122   :  { %1077 = vmatprep.subr.bf16.mxu1 %v1143_v34 }
 0x124   :  { %963 = vmatmul.mubr.msk.f32.vlgmr.msra.gmra.mrb[0].mxu1 %vm211_vm3, %v1148_v57 }
 0x125   :  { %1079 = vmatpush3.bf16.msra.mxu1 %v1078_v54  ;;  %973 = vmatprep.mubr.msk.f32.mxu1 %vm1144_vm2, %v1145_v35 }
 0x126   :  { %1080 = vmatprep.subr.bf16.mxu1 %v1143_v34 }
 0x129   :  { %1082 = vmatpush3.bf16.msra.mxu1 %v1081_v58 }
 0x12c   :  { %974 = vmatmul.mubr.msk.f32.vlgmr.msra.gmra.mrb[2].mxu1 %vm211_vm3, %v1148_v57 }
 0x12d   :  { %984 = vmatprep.mubr.msk.f32.mxu1 %vm211_vm3, %v424_v59  ;;  %v442_v59 = vpop.permute.xlu0 %441 }
 0x1f7   :  { %v281_v61 = vpop.f32.mrb[0].mxu1 }
 0x1f8   :  { %v964_v62 = vpop.f32.mrb[1].mxu1  ;;  %v359_v0 = vmul.f32 %v281_v61, %v281_v61  ;;  %v367_v16 = vrot.slane %v281_v61, %v1347_v9  ;;  %v438_v61 = vpop.permute.xlu1 %437 }
 0x1fa   :  { %v369_v20 = vsub.f32 %v1320_v42, %v367_v16  ;;  %v370_v22 = vsub.f32 %v203_v50, %v367_v16  ;;  %v368_v23 = vsub.f32 %v1322_v44, %v367_v16  ;;  %v371_v24 = vsub.f32 %v208_v48, %v367_v16  ;;  %v426_v48 = vld [vmem:[%s1404_s2 + $0x10] sm:$0xff] }
 0x1fb   :  { %v1150_v50 = vmov 4  }
 0x1fc   :  { %1130 = vset.pattern.permute.xlu1 %v1150_v50  ;;  %1131 = vset.pattern.permute.xlu0 %v1150_v50 }
 0x1fd   :  { %707 = vperm.xlu1 %1130, %v1220_v11   ;;  %711 = vperm.xlu0 %1131, %v1232_v14  }
 0x1ff   :  { %v355_v1 = vpop.f32.mrb[2].mxu1 }
 0x200   :  { %v360_v3 = vsub.f32 %v355_v1, %v359_v0  ;;  %v975_v4 = vpop.f32.mrb[3].mxu1 }
 0x201   :  { %1132 = vset.pattern.permute.xlu1 %v1151_v51  ;;  %715 = vperm.xlu0 %1131, %v1225_v12  }
 0x202   :  { %v361_v5 = vmax.f32 %v360_v3, 0.0  ;;  %727 = vperm.xlu1 %1132, %v1220_v11  }
 0x204   :  { %v362_v8 = vadd.f32 1e-05, %v361_v5  ;;  %v24_v5 = vld [vmem:[%s1403_s4] sm:$0x3] }
 0x205   :  { %1134 = vset.pattern.permute.xlu0 %v1151_v51 }
 0x206   :  { %1138 = vrsqrt.f32 %v362_v8  ;;  %731 = vperm.xlu1 %1132, %v1232_v14   ;;  %735 = vperm.xlu0 %1134, %v1225_v12  }
 0x20a   :  { %1133 = vset.pattern.permute.xlu1 %v1150_v50 }
 0x20b   :  { %719 = vperm.xlu1 %1133, %v1237_v15  }
 0x20f   :  { %1135 = vset.pattern.permute.xlu1 %v1151_v51 }
 0x210   :  { %v1139_v19 = vpop.eup %1138  ;;  %739 = vperm.xlu1 %1135, %v1237_v15  }
 0x211   :  { %v375_v21 = vrot.slane %v1139_v19, %v1347_v9 }
 0x213   :  { %v377_v25 = vmul.f32 %v375_v21, %v369_v20  ;;  %v378_v26 = vmul.f32 %v375_v21, %v370_v22  ;;  %v376_v27 = vmul.f32 %v375_v21, %v368_v23  ;;  %v379_v28 = vmul.f32 %v375_v21, %v371_v24 }
 0x215   :  { %v397_v31 = vmul.f32 %v386_v63, %v377_v25  ;;  %v398_v32 = vmul.f32 %v390_v10, %v378_v26  ;;  %v396_v33 = vmul.f32 %v382_v13, %v376_v27  ;;  %v399_v36 = vmul.f32 %v394_v17, %v379_v28 }
 0x217   :  { %v416_v37 = vadd.f32 %v402_v6, %v396_v33  ;;  %v417_v38 = vadd.f32 %v406_v18, %v397_v31  ;;  %v419_v39 = vadd.f32 %v414_v29, %v399_v36  ;;  %v418_v40 = vadd.f32 %v410_v30, %v398_v32 }
 0x218   :  { %v1152_v6 = vmov 6  }
 0x219   :  { %v420_v41 = vmax.f32 %v416_v37, 0.0  ;;  %v421_v42 = vmax.f32 %v417_v38, 0.0  ;;  %v423_v43 = vmax.f32 %v419_v39, 0.0  ;;  %v422_v45 = vmax.f32 %v418_v40, 0.0  ;;  %1136 = vset.pattern.permute.xlu1 %v1152_v6  ;;  %1137 = vset.pattern.permute.xlu0 %v1152_v6 }
 0x21a   :  { %753 = vperm.xlu1 %1136, %v24_v5  }
 0x21b   :  { %v1083_v44 = vpack.c.bf16 %v421_v42, %v420_v41  ;;  %v1087_v46 = vpack.c.bf16 %v423_v43, %v422_v45 }
 0x21d   :  { %1084 = vmatprep.subr.bf16.mxu1 %v1083_v44 }
 0x21e   :  { %1086 = vmatpush3.bf16.msra.mxu1 %v1083_v44 }
 0x21f   :  { %1088 = vmatprep.subr.bf16.mxu1 %v1087_v46 }
 0x222   :  { %1090 = vmatpush3.bf16.msra.mxu1 %v1087_v46 }
 0x223   :  { %1091 = vmatprep.subr.bf16.mxu1 %v1143_v34 }
 0x225   :  { %985 = vmatmul.mubr.msk.f32.vlgmr.msra.gmra.mrb[4].mxu1 %vm211_vm3, %v425_v47 }
 0x226   :  { %987 = vmatprep.mubr.msk.f32.mxu1 %vm211_vm3, %v426_v48 }
 0x229   :  { %988 = vmatmul.mubr.msk.f32.gmra.mrb[6].mxu1 %vm211_vm3, %v427_v49 }
 0x22a   :  { %998 = vmatprep.mubr.msk.f32.mxu1 %vm1144_vm2, %v1145_v35 }
 0x27c   :  { %v708_v13 = vpop.permute.xlu1 %707 }
 0x281   :  { %v728_v20 = vpop.permute.xlu1 %727 }
 0x285   :  { %v732_v21 = vpop.permute.xlu1 %731 }
 0x28a   :  { %v720_v24 = vpop.permute.xlu1 %719 }
 0x28f   :  { %v740_v37 = vpop.permute.xlu1 %739 }
 0x2f8   :  { %v986_v54 = vpop.f32.mrb[4].mxu1 }
 0x2f9   :  { %v528_v55 = vadd.f32 %v986_v54, %v434_v53  ;;  %v522_v56 = vpop.f32.mrb[5].mxu1  ;;  %v754_v53 = vpop.permute.xlu1 %753 }
 0x2fa   :  { %v523_v58 = vadd.f32 %v522_v56, %v430_v52  ;;  %v750_v52 = vld [vmem:[%s1405_s3] sm:$0x3] }
 0x2fb   :  { %v612_v12 = vmul.f32 %v528_v55, %v528_v55 }
 0x2fc   :  { %v1092_v60 = vpack.c.bf16 %v528_v55, %v523_v58  ;;  %v989_v11 = vpop.f32.mrb[6].mxu1  ;;  %v611_v0 = vmul.f32 %v523_v58, %v523_v58 }
 0x2fd   :  { %v538_v62 = vadd.f32 %v989_v11, %v442_v59  ;;  %v532_v14 = vpop.f32.mrb[7].mxu1 }
 0x2fe   :  { %v533_v63 = vadd.f32 %v532_v14, %v438_v61  ;;  %1093 = vmatpush3.bf16.msra.mxu1 %v1092_v60  ;;  %v1098_v15 = vpack.c.bf16 %v612_v12, %v611_v0 }
 0x2ff   :  { %1094 = vmatprep.subr.bf16.mxu1 %v1143_v34  ;;  %v614_v2 = vmul.f32 %v538_v62, %v538_v62 }
 0x300   :  { %v1095_v1 = vpack.c.bf16 %v538_v62, %v533_v63  ;;  %v613_v3 = vmul.f32 %v533_v63, %v533_v63 }
 0x302   :  { %1096 = vmatpush3.bf16.msra.mxu1 %v1095_v1  ;;  %v1101_v4 = vpack.c.bf16 %v614_v2, %v613_v3 }
 0x303   :  { %1097 = vmatprep.subr.bf16.mxu1 %v1143_v34 }
 0x305   :  { %999 = vmatmul.mubr.msk.f32.vlgmr.msra.gmra.mrb[8].mxu1 %vm211_vm3, %v1148_v57 }
 0x306   :  { %1099 = vmatpush3.bf16.msra.mxu1 %v1098_v15  ;;  %1009 = vmatprep.mubr.msk.f32.mxu1 %vm1144_vm2, %v1145_v35 }
 0x307   :  { %1100 = vmatprep.subr.bf16.mxu1 %v1143_v34 }
 0x30a   :  { %1102 = vmatpush3.bf16.msra.mxu1 %v1101_v4 }
 0x30b   :  { %1103 = vmatprep.subr.bf16.mxu1 %v1143_v34 }
 0x30d   :  { %1010 = vmatmul.mubr.msk.f32.vlgmr.msra.gmra.mrb[10].mxu1 %vm211_vm3, %v1148_v57 }
 0x30e   :  { %1020 = vmatprep.mubr.msk.f32.mxu1 %vm1144_vm2, %v1145_v35  ;;  %v712_v35 = vpop.permute.xlu0 %711 }
 0x312   :  { %v716_v23 = vpop.permute.xlu0 %715 }
 0x316   :  { %v736_v38 = vpop.permute.xlu0 %735 }
 0x3d8   :  { %v607_v7 = vpop.f32.mrb[8].mxu1 }
 0x3d9   :  { %v1000_v8 = vpop.f32.mrb[9].mxu1  ;;  %v685_v10 = vmul.f32 %v607_v7, %v607_v7  ;;  %v693_v22 = vrot.slane %v607_v7, %v1347_v9 }
 0x3db   :  { %v694_v26 = vsub.f32 %v523_v58, %v693_v22  ;;  %v695_v28 = vsub.f32 %v528_v55, %v693_v22  ;;  %v696_v29 = vsub.f32 %v533_v63, %v693_v22  ;;  %v697_v30 = vsub.f32 %v538_v62, %v693_v22 }
 0x3e0   :  { %v681_v16 = vpop.f32.mrb[10].mxu1 }
 0x3e1   :  { %v686_v17 = vsub.f32 %v681_v16, %v685_v10  ;;  %v1011_v18 = vpop.f32.mrb[11].mxu1 }
 0x3e3   :  { %v687_v19 = vmax.f32 %v686_v17, 0.0 }
 0x3e5   :  { %v688_v57 = vadd.f32 1e-05, %v687_v19 }
 0x3e7   :  { %1140 = vrsqrt.f32 %v688_v57 }
 0x3f1   :  { %v1141_v25 = vpop.eup %1140 }
 0x3f2   :  { %v701_v27 = vrot.slane %v1141_v25, %v1347_v9 }
 0x3f4   :  { %v702_v31 = vmul.f32 %v701_v27, %v694_v26  ;;  %v703_v32 = vmul.f32 %v701_v27, %v695_v28  ;;  %v704_v33 = vmul.f32 %v701_v27, %v696_v29  ;;  %v705_v36 = vmul.f32 %v701_v27, %v697_v30 }
 0x3f6   :  { %v722_v39 = vmul.f32 %v708_v13, %v702_v31  ;;  %v723_v40 = vmul.f32 %v712_v35, %v703_v32  ;;  %v724_v41 = vmul.f32 %v716_v23, %v704_v33  ;;  %v725_v42 = vmul.f32 %v720_v24, %v705_v36 }
 0x3f8   :  { %v742_v43 = vadd.f32 %v728_v20, %v722_v39  ;;  %v743_v45 = vadd.f32 %v732_v21, %v723_v40  ;;  %v745_v44 = vadd.f32 %v740_v37, %v725_v42  ;;  %v744_v46 = vadd.f32 %v736_v38, %v724_v41 }
 0x3fa   :  { %v746_v47 = vmax.f32 %v742_v43, 0.0  ;;  %v747_v48 = vmax.f32 %v743_v45, 0.0  ;;  %v749_v9 = vmax.f32 %v745_v44, 0.0  ;;  %v748_v49 = vmax.f32 %v744_v46, 0.0 }
 0x3fc   :  { %v1104_v50 = vpack.c.bf16 %v747_v48, %v746_v47  ;;  %v1107_v51 = vpack.c.bf16 %v749_v9, %v748_v49 }
 0x3fe   :  { %1105 = vmatpush3.bf16.msra.mxu1 %v1104_v50 }
 0x3ff   :  { %1106 = vmatprep.subr.bf16.mxu1 %v1143_v34 }
 0x402   :  { %1108 = vmatpush3.bf16.msra.mxu1 %v1107_v51 }
 0x405   :  { %1021 = vmatmul.mubr.msk.f32.vlgmr.msra.gmra.mrb[12].mxu1 %vm211_vm3, %v750_v52 }
 0x4d8   :  { %v825_v54 = vpop.f32.mrb[12].mxu1 }
 0x4d9   :  { %v826_v55 = vadd.f32 %v825_v54, %v754_v53  ;;  %v1022_v56 = vpop.f32.mrb[13].mxu1 }
 0x4db   :  { %829 = vst [vmem:[%s1406_s5] sm:$0x3] %v826_v55 }

</bundles_post_ra>
